<compile_context>
chip_gen: v7x
topology: tpu7x:2x2x1
jax: 0.10.0
libtpu: 0.0.40
codegen_flags: <defaults>
</compile_context>

<pallas_src>
import jax
import jax.numpy as jnp
from jax.experimental import pallas as pl
from jax.experimental.pallas import tpu as pltpu


def _round_up(x, m):
    return (x + m - 1) // m * m


def _actor_mlp_kernel(obs_ref, w1_ref, b1_ref, w2_ref, b2_ref, w3_ref, b3_ref,
                      mu_ref):
    # obs_ref: (bm, F)                 w1: (F, H)      b1: (1, H)  [f32]
    # mu_ref:  (bm, A_pad)             w2: (H, H)      b2: (1, H)  [f32]
    #                                  w3: (H, A_pad)  b3: (1, A_pad) [f32]
    cdt = w1_ref.dtype  # MXU operand dtype (bf16 by default, f32 exact path)
    x = obs_ref[...].astype(cdt)
    h = jnp.dot(x, w1_ref[...], preferred_element_type=jnp.float32) + b1_ref[...]
    h = jnp.maximum(h, 0.0)
    h = jnp.dot(h.astype(cdt), w2_ref[...],
                preferred_element_type=jnp.float32) + b2_ref[...]
    h = jnp.maximum(h, 0.0)
    mu = jnp.dot(h.astype(cdt), w3_ref[...],
                 preferred_element_type=jnp.float32) + b3_ref[...]
    mu_ref[...] = jnp.tanh(mu).astype(mu_ref.dtype)


def actor_forward(obs, params, std=None, *, block_rows=512,
                  matmul_dtype=jnp.bfloat16):
    """Pallas implementation of Actor.forward (policy MLP + tanh).

    obs:    (N, feature_dim) float32
    params: dict with w1 (F,H), b1 (1,H), w2 (H,H), b2 (1,H), w3 (H,A), b3 (1,A)
            (weights stored input-major, i.e. already transposed vs torch Linear)
    std:    None -> return mu;  scalar -> return (mu, scale) arrays.
    """
    w1 = params["w1"].astype(matmul_dtype)
    w2 = params["w2"].astype(matmul_dtype)
    w3 = params["w3"].astype(matmul_dtype)
    b1 = params["b1"].astype(jnp.float32)
    b2 = params["b2"].astype(jnp.float32)
    b3 = params["b3"].astype(jnp.float32)

    n, feature_dim = obs.shape
    hidden_dim = w1.shape[1]
    action_dim = w3.shape[1]

    # Lane-dense final layer: pad output columns (and w3/b3) to a multiple of
    # 128 so the layer-3 matmul and the mu writeback are full-width, unmasked.
    a_pad = _round_up(action_dim, 128)
    if a_pad != action_dim:
        w3 = jnp.pad(w3, ((0, 0), (0, a_pad - action_dim)))
        b3 = jnp.pad(b3, ((0, 0), (0, a_pad - action_dim)))

    # Row tile: multiple of 8 sublanes.  Tiny batches use a single full-extent
    # block (block dim == full array dim is always legal, no padding needed).
    block_rows = max(8, block_rows - block_rows % 8)
    bm = n if n <= block_rows else block_rows
    # v7x: keep >=2 "parallel" grid steps for large batches (2 TensorCores).
    if n > 256 and pl.cdiv(n, bm) < 2:
        bm = _round_up(pl.cdiv(n, 2), 128)
    grid = (pl.cdiv(n, bm),)

    mu = pl.pallas_call(
        _actor_mlp_kernel,
        out_shape=jax.ShapeDtypeStruct((n, a_pad), obs.dtype),
        grid_spec=pltpu.PrefetchScalarGridSpec(
            num_scalar_prefetch=0,
            grid=grid,
            in_specs=[
                pl.BlockSpec((bm, feature_dim), lambda i: (i, 0)),
                pl.BlockSpec((feature_dim, hidden_dim), lambda i: (0, 0)),
                pl.BlockSpec((1, hidden_dim), lambda i: (0, 0)),
                pl.BlockSpec((hidden_dim, hidden_dim), lambda i: (0, 0)),
                pl.BlockSpec((1, hidden_dim), lambda i: (0, 0)),
                pl.BlockSpec((hidden_dim, a_pad), lambda i: (0, 0)),
                pl.BlockSpec((1, a_pad), lambda i: (0, 0)),
            ],
            out_specs=pl.BlockSpec((bm, a_pad), lambda i: (i, 0)),
        ),
        compiler_params=pltpu.CompilerParams(
            dimension_semantics=("parallel",),
            # Large row tiles + VMEM-resident weights overflow v5e's 16 MiB
            # scoped default; 64 MiB is within every generation's physical VMEM.
            vmem_limit_bytes=64 * 1024 * 1024,
        ),
    )(obs, w1, b1, w2, b2, w3, b3)

    if a_pad != action_dim:
        mu = mu[:, :action_dim]
    if std is None:
        return mu
    # TODO(synk): utils.TruncatedNormal (sampling / log_prob / clamped sample)
    # is a distribution object with no Pallas equivalent; return (mu, scale).
    return mu, jnp.ones_like(mu) * std


if __name__ == "__main__":
    key = jax.random.PRNGKey(0)
    ks = jax.random.split(key, 7)

    # Actor.forward (as specified) only applies self.policy + tanh, so obs has
    # feature_dim columns.  Small, deterministic test shapes.
    batch, feature_dim, hidden_dim, action_dim = 20, 32, 32, 6

    obs = jax.random.normal(ks[0], (batch, feature_dim), dtype=jnp.float32)
    params = {
        "w1": 0.1 * jax.random.normal(ks[1], (feature_dim, hidden_dim), jnp.float32),
        "b1": 0.01 * jax.random.normal(ks[2], (1, hidden_dim), jnp.float32),
        "w2": 0.1 * jax.random.normal(ks[3], (hidden_dim, hidden_dim), jnp.float32),
        "b2": 0.01 * jax.random.normal(ks[4], (1, hidden_dim), jnp.float32),
        "w3": 0.1 * jax.random.normal(ks[5], (hidden_dim, action_dim), jnp.float32),
        "b3": 0.01 * jax.random.normal(ks[6], (1, action_dim), jnp.float32),
    }

    # Pure-JAX f32 reference of the spec's forward (std=None path).
    h = jnp.maximum(obs @ params["w1"] + params["b1"], 0.0)
    h = jnp.maximum(h @ params["w2"] + params["b2"], 0.0)
    ref = jnp.tanh(h @ params["w3"] + params["b3"])

    # 1) Exact-math path (f32 MXU operands) with a multi-block, ragged grid
    #    (block_rows=8 -> blocks of 8,8,4 rows) to exercise partial blocks.
    mu_f32 = actor_forward(obs, params, matmul_dtype=jnp.float32, block_rows=8)
    jax.block_until_ready(mu_f32)
    assert mu_f32.shape == (batch, action_dim)
    assert jnp.allclose(mu_f32, ref, atol=1e-5, rtol=1e-5), "f32 path mismatch"

    # 2) Default fast path (bf16 MXU operands, f32 accumulation), single block.
    mu = actor_forward(obs, params)
    jax.block_until_ready(mu)
    assert mu.shape == (batch, action_dim)
    assert jnp.allclose(mu, ref, atol=3e-2, rtol=3e-2), "bf16 path mismatch"

    # 3) std path (returns (mu, scale) arrays instead of a distribution).
    mu2, scale = actor_forward(obs, params, std=0.1)
    jax.block_until_ready((mu2, scale))
    assert jnp.allclose(mu2, mu, atol=1e-6)
    assert jnp.allclose(scale, 0.1 * jnp.ones_like(mu), atol=1e-7)

    print("KERNEL_OK")
</pallas_src>

<mosaic_0001>
module attributes {stable_mosaic.version = 11 : i64} {
  func.func @_actor_mlp_kernel(%arg0: i32, %arg1: memref<8x32xf32, #tpu.memory_space<vmem>>, %arg2: memref<32x32xf32, #tpu.memory_space<vmem>>, %arg3: memref<1x32xf32, #tpu.memory_space<vmem>>, %arg4: memref<32x32xf32, #tpu.memory_space<vmem>>, %arg5: memref<1x32xf32, #tpu.memory_space<vmem>>, %arg6: memref<32x128xf32, #tpu.memory_space<vmem>>, %arg7: memref<1x128xf32, #tpu.memory_space<vmem>>, %arg8: memref<8x128xf32, #tpu.memory_space<vmem>>) attributes {dimension_semantics = [#tpu.dimension_semantics<parallel>], iteration_bounds = array<i64: 3>, scalar_prefetch = 0 : i64, scratch_operands = 0 : i64, tpu.core_type = #tpu.core_type<tc>, window_params = [{transform_indices = @transform_0, window_bounds = array<i64: 8, 32>}, {pipeline_mode = #tpu.pipeline_mode<synchronous>, transform_indices = @transform_1, window_bounds = array<i64: 32, 32>}, {pipeline_mode = #tpu.pipeline_mode<synchronous>, transform_indices = @transform_2, window_bounds = array<i64: 1, 32>}, {pipeline_mode = #tpu.pipeline_mode<synchronous>, transform_indices = @transform_3, window_bounds = array<i64: 32, 32>}, {pipeline_mode = #tpu.pipeline_mode<synchronous>, transform_indices = @transform_4, window_bounds = array<i64: 1, 32>}, {pipeline_mode = #tpu.pipeline_mode<synchronous>, transform_indices = @transform_5, window_bounds = array<i64: 32, 128>}, {pipeline_mode = #tpu.pipeline_mode<synchronous>, transform_indices = @transform_6, window_bounds = array<i64: 1, 128>}, {transform_indices = @transform_7, window_bounds = array<i64: 8, 128>}]} {
    %c0 = arith.constant 0 : index
    %c0_0 = arith.constant 0 : index
    %0 = vector.load %arg1[%c0, %c0_0] : memref<8x32xf32, #tpu.memory_space<vmem>>, vector<8x32xf32>
    %c0_1 = arith.constant 0 : index
    %c0_2 = arith.constant 0 : index
    %1 = vector.load %arg2[%c0_1, %c0_2] : memref<32x32xf32, #tpu.memory_space<vmem>>, vector<32x32xf32>
    %cst = arith.constant dense<0.000000e+00> : vector<8x32xf32>
    %2 = tpu.matmul %0, %1, %cst {dimension_numbers = #tpu.dot_dimension_numbers<[1], [0], [0], [1], [0, 0, 1, 1], [], []>} : vector<8x32xf32>, vector<32x32xf32>, vector<8x32xf32> -> vector<8x32xf32>
    %c0_3 = arith.constant 0 : index
    %c0_4 = arith.constant 0 : index
    %3 = vector.load %arg3[%c0_3, %c0_4] : memref<1x32xf32, #tpu.memory_space<vmem>>, vector<1x32xf32>
    %4 = vector.broadcast %3 : vector<1x32xf32> to vector<8x32xf32>
    %5 = arith.addf %2, %4 : vector<8x32xf32>
    %cst_5 = arith.constant 0.000000e+00 : f32
    %6 = vector.broadcast %cst_5 : f32 to vector<8x32xf32>
    %7 = arith.maximumf %5, %6 : vector<8x32xf32>
    %c0_6 = arith.constant 0 : index
    %c0_7 = arith.constant 0 : index
    %8 = vector.load %arg4[%c0_6, %c0_7] : memref<32x32xf32, #tpu.memory_space<vmem>>, vector<32x32xf32>
    %cst_8 = arith.constant dense<0.000000e+00> : vector<8x32xf32>
    %9 = tpu.matmul %7, %8, %cst_8 {dimension_numbers = #tpu.dot_dimension_numbers<[1], [0], [0], [1], [0, 0, 1, 1], [], []>} : vector<8x32xf32>, vector<32x32xf32>, vector<8x32xf32> -> vector<8x32xf32>
    %c0_9 = arith.constant 0 : index
    %c0_10 = arith.constant 0 : index
    %10 = vector.load %arg5[%c0_9, %c0_10] : memref<1x32xf32, #tpu.memory_space<vmem>>, vector<1x32xf32>
    %11 = vector.broadcast %10 : vector<1x32xf32> to vector<8x32xf32>
    %12 = arith.addf %9, %11 : vector<8x32xf32>
    %cst_11 = arith.constant 0.000000e+00 : f32
    %13 = vector.broadcast %cst_11 : f32 to vector<8x32xf32>
    %14 = arith.maximumf %12, %13 : vector<8x32xf32>
    %c0_12 = arith.constant 0 : index
    %c0_13 = arith.constant 0 : index
    %15 = vector.load %arg6[%c0_12, %c0_13] : memref<32x128xf32, #tpu.memory_space<vmem>>, vector<32x128xf32>
    %cst_14 = arith.constant dense<0.000000e+00> : vector<8x128xf32>
    %16 = tpu.matmul %14, %15, %cst_14 {dimension_numbers = #tpu.dot_dimension_numbers<[1], [0], [0], [1], [0, 0, 1, 1], [], []>} : vector<8x32xf32>, vector<32x128xf32>, vector<8x128xf32> -> vector<8x128xf32>
    %c0_15 = arith.constant 0 : index
    %c0_16 = arith.constant 0 : index
    %17 = vector.load %arg7[%c0_15, %c0_16] : memref<1x128xf32, #tpu.memory_space<vmem>>, vector<1x128xf32>
    %18 = vector.broadcast %17 : vector<1x128xf32> to vector<8x128xf32>
    %19 = arith.addf %16, %18 : vector<8x128xf32>
    %20 = math.tanh %19 : vector<8x128xf32>
    %c0_17 = arith.constant 0 : index
    %c0_18 = arith.constant 0 : index
    %21 = vector.load %arg8[%c0_17, %c0_18] : memref<8x128xf32, #tpu.memory_space<vmem>>, vector<8x128xf32>
    tpu.vector_store %arg8[%c0_17, %c0_18], %20 {strides = array<i32>} : memref<8x128xf32, #tpu.memory_space<vmem>>, vector<8x128xf32>,
    return
  }
  func.func @transform_0(%arg0: i32) -> (i32, i32) {
    %c0_i32 = arith.constant 0 : i32
    %c0_i32_0 = arith.constant 0 : i32
    return %arg0, %c0_i32 : i32, i32
  }
  func.func @transform_1(%arg0: i32) -> (i32, i32) {
    %c0_i32 = arith.constant 0 : i32
    %c0_i32_0 = arith.constant 0 : i32
    %c0_i32_1 = arith.constant 0 : i32
    return %c0_i32, %c0_i32_0 : i32, i32
  }
  func.func @transform_2(%arg0: i32) -> (i32, i32) {
    %c0_i32 = arith.constant 0 : i32
    %c0_i32_0 = arith.constant 0 : i32
    %c0_i32_1 = arith.constant 0 : i32
    return %c0_i32, %c0_i32_0 : i32, i32
  }
  func.func @transform_3(%arg0: i32) -> (i32, i32) {
    %c0_i32 = arith.constant 0 : i32
    %c0_i32_0 = arith.constant 0 : i32
    %c0_i32_1 = arith.constant 0 : i32
    return %c0_i32, %c0_i32_0 : i32, i32
  }
  func.func @transform_4(%arg0: i32) -> (i32, i32) {
    %c0_i32 = arith.constant 0 : i32
    %c0_i32_0 = arith.constant 0 : i32
    %c0_i32_1 = arith.constant 0 : i32
    return %c0_i32, %c0_i32_0 : i32, i32
  }
  func.func @transform_5(%arg0: i32) -> (i32, i32) {
    %c0_i32 = arith.constant 0 : i32
    %c0_i32_0 = arith.constant 0 : i32
    %c0_i32_1 = arith.constant 0 : i32
    return %c0_i32, %c0_i32_0 : i32, i32
  }
  func.func @transform_6(%arg0: i32) -> (i32, i32) {
    %c0_i32 = arith.constant 0 : i32
    %c0_i32_0 = arith.constant 0 : i32
    %c0_i32_1 = arith.constant 0 : i32
    return %c0_i32, %c0_i32_0 : i32, i32
  }
  func.func @transform_7(%arg0: i32) -> (i32, i32) {
    %c0_i32 = arith.constant 0 : i32
    %c0_i32_0 = arith.constant 0 : i32
    return %arg0, %c0_i32 : i32, i32
  }
}

</mosaic_0001>

<bundles_post_ra>
// kernel: tpu_custom_call.1
= control target key start
LH: loop header
LB: loop body
LE: loop exit
PB: predicated region body
PF: predicated region fallthrough
CT: control target
= control target key end

     0   :  { %12 = vsyncpa [#allocation3], 0  ;;  %s1652_s0 = inlined_call_operand.hbm [shape: f32[20,32], index: 0, kind: input, shape index: {}]   ;;  %s1653_s1 = inlined_call_operand.hbm [shape: f32[32,32], index: 1, kind: input, shape index: {}]   ;;  %s1654_s2 = inlined_call_operand.hbm [shape: f32[1,32], index: 2, kind: input, shape index: {}]   ;;  %s1655_s3 = inlined_call_operand.hbm [shape: f32[32,32], index: 3, kind: input, shape index: {}]   ;;  %s1656_s4 = inlined_call_operand.hbm [shape: f32[1,32], index: 4, kind: input, shape index: {}]   ;;  %s1657_s5 = inlined_call_operand.hbm [shape: f32[32,128], index: 5, kind: input, shape index: {}]   ;;  %s1658_s6 = inlined_call_operand.hbm [shape: f32[1,128], index: 6, kind: input, shape index: {}]   ;;  %s1659_s7 = inlined_call_operand.hbm [shape: f32[20,128], index: 7, kind: output, shape index: {}]  }
   0x1   :  { %14 = vsyncpa [#allocation3 + $0x1], 0 }
   0x2   :  { %15 = vsyncpa [#allocation6], 0 }
   0x3   :  { %16 = vsyncpa [#allocation9], 0 }
   0x4   :  { %17 = vsyncpa [#allocation12], 0 }
   0x5   :  { %18 = vsyncpa [#allocation4], 0 }
   0x6   :  { %20 = vsyncpa [#allocation4 + $0x1], 0  ;;  %s1315_s24 = smov 0   ;;  %s1317_s25 = smov 0  }
   0x7   :  { %s1319_s26 = smov 0   ;;  %s1321_s27 = smov 0  }
   0x8 LB: > { %s1262_s28 = smov [#allocation5]   ;;  %s1336_s30 = sadd.s32 4294967295, %s1260_s27   ;;  %s1260_s27 = sphi %s1321_s27, %s1684_s27   ;;  %s1256_s26 = sphi %s1319_s26, %s1683_s26   ;;  %s1252_s25 = sphi %s1317_s25, %s1682_s25   ;;  %s1248_s24 = sphi %s1315_s24, %s1681_s24  }
   0x9   : > { %s221_s29 = sshll.u32 %s1262_s28, 4  ;;  %p775_p0 = scmp.ge.s32.totalorder %s1260_s27, 1  ;;  %s1341_s29 = int_to_ptr.vmem [resolvable:$true] %s221_s29 }
   0xa   : > { %p1660_p1 = scmp.eq.s32.totalorder %s1336_s30, 0  ;;  %p209_p2 = scmp.lt.s32.totalorder %s1260_s27, 4 }
   0xb   : > { %s1263_s9 = smov [#allocation8]   ;;  %s1264_s12 = smov [#allocation11]  }
   0xc   : > { %p1343_p3 = pnand %p775_p0, %p209_p2  ;;  %s245_s10 = sshll.u32 %s1263_s9, 4  ;;  %s1355_s10 = int_to_ptr.vmem [resolvable:$true] %s245_s10 }
   0xd   : > { %s269_s13 = sshll.u32 %s1264_s12, 4  ;;  %s984_s16 = scalar_lea.hbm %s1653_s1, 512  ;;  %s1357_s13 = int_to_ptr.vmem [resolvable:$true] %s269_s13 }
   0xe   : > { %s1663_s8 = scalar_select %p1343_p3, 1, 0 }
   0xf   : > { %p898_p4 = pneg %p1343_p3  ;;  %p985_p6 = scmp.ne.s32.totalorder %s1653_s1, %s984_s16 }
  0x10   : > { %p991_p10 = scmp.lt.u32.totalorder %s984_s16, %s1653_s1 }
  0x11   : > { %p1351_p5 = pnand %p898_p4, %p1660_p1 }
  0x13   : > { %p1367_p7 = pneg %p1351_p5 }
  0x15   : > { %p987_p8 = pnand %p1367_p7, %p985_p6 }
  0x17   : > { %p988_p9 = pneg %p987_p8 }
  0x19   : > { %p993_p11 = pnand %p991_p10, %p988_p9 }
  0x1b   : > { %996 = shalt.err (!%p993_p11)
}
  0x1c   : > { %s997_s22 = scalar_lea.vmem %s1341_s29, 512  ;;  %p1005_p2 = scmp.lt.s32.totalorder %s1341_s29, %s1341_s29 }
  0x1d   : > { %p998_p12 = scmp.ne.s32.totalorder %s1341_s29, %s997_s22  ;;  %p1006_p4 = scmp.lt.s32.totalorder %s997_s22, %s997_s22 }
  0x1f   : > { %p1000_p13 = pnand %p998_p12, %p1367_p7  ;;  %p1007_p6 = por %p1006_p4, %p1005_p2 }
  0x21   : > { %p1001_p0 = pneg %p1000_p13 }
  0x23   : > { %p1008_p8 = pnand %p1007_p6, %p1001_p0 }
  0x25   : > { %1011 = shalt.err (!%p1008_p8)
}
  0x26   : > { %s1265_s23 = smov 128   ;;  %s1266_s28 = smov 8  }
  0x27   : > { %901 = dma.hbm_to_vmem [thread:$0]  (!%p1351_p5), %s1653_s1, 512, %s1341_s29, [#allocation6], %s1265_s23, %s1265_s23, %s1266_s28  }
  0x28   : > { %s1012_s16 = scalar_lea.hbm %s1655_s3, 512 }
  0x29   : > { %p1013_p9 = scmp.ne.s32.totalorder %s1655_s3, %s1012_s16  ;;  %p1019_p12 = scmp.lt.u32.totalorder %s1012_s16, %s1655_s3 }
  0x2b   : > { %p1015_p10 = pnand %p1013_p9, %p1367_p7 }
  0x2d   : > { %p1016_p11 = pneg %p1015_p10 }
  0x2f   : > { %p1021_p13 = pnand %p1019_p12, %p1016_p11 }
  0x31   : > { %1024 = shalt.err (!%p1021_p13)
}
  0x32   : > { %s1025_s29 = scalar_lea.vmem %s1355_s10, 512  ;;  %p1033_p6 = scmp.lt.s32.totalorder %s1355_s10, %s1355_s10 }
  0x33   : > { %p1026_p0 = scmp.ne.s32.totalorder %s1355_s10, %s1025_s29  ;;  %p1034_p8 = scmp.lt.s32.totalorder %s1025_s29, %s1025_s29 }
  0x35   : > { %p1028_p2 = pnand %p1026_p0, %p1367_p7  ;;  %p1035_p9 = por %p1034_p8, %p1033_p6 }
  0x37   : > { %p1029_p4 = pneg %p1028_p2 }
  0x39   : > { %p1036_p10 = pnand %p1035_p9, %p1029_p4 }
  0x3b   : > { %1039 = shalt.err (!%p1036_p10)
}
  0x3c   : > { %907 = dma.hbm_to_vmem [thread:$0]  (!%p1351_p5), %s1655_s3, 512, %s1355_s10, [#allocation9], %s1265_s23, %s1265_s23, %s1266_s28  }
  0x3d   : > { %s1040_s15 = scalar_lea.hbm %s1657_s5, 512 }
  0x3e   : > { %p1041_p11 = scmp.ne.s32.totalorder %s1657_s5, %s1040_s15  ;;  %p1047_p0 = scmp.lt.u32.totalorder %s1040_s15, %s1657_s5 }
  0x40   : > { %p1043_p12 = pnand %p1041_p11, %p1367_p7 }
  0x42   : > { %p1044_p13 = pneg %p1043_p12 }
  0x44   : > { %p1049_p2 = pnand %p1047_p0, %p1044_p13 }
  0x46   : > { %1052 = shalt.err (!%p1049_p2)
}
  0x47   : > { %s1053_s10 = scalar_lea.vmem %s1357_s13, 512  ;;  %p1061_p9 = scmp.lt.s32.totalorder %s1357_s13, %s1357_s13 }
  0x48   : > { %p1054_p4 = scmp.ne.s32.totalorder %s1357_s13, %s1053_s10  ;;  %p1062_p10 = scmp.lt.s32.totalorder %s1053_s10, %s1053_s10 }
  0x4a   : > { %p1056_p6 = pnand %p1054_p4, %p1367_p7  ;;  %p1063_p11 = por %p1062_p10, %p1061_p9 }
  0x4c   : > { %p1057_p8 = pneg %p1056_p6 }
  0x4e   : > { %p1064_p12 = pnand %p1063_p11, %p1057_p8 }
  0x50   : > { %1067 = shalt.err (!%p1064_p12)
}
  0x51   : > { %913 = dma.hbm_to_vmem [thread:$0]  (!%p1351_p5), %s1657_s5, 512, %s1357_s13, [#allocation12], %s1265_s23, %s1265_s23, %s1266_s28  }
  0x52   : > { %s1267_s22 = smov [#allocation7]   ;;  %s1268_s12 = smov [#allocation10]  }
  0x53   : > { %s235_s9 = sshll.u32 %s1267_s22, 4  ;;  %s259_s14 = sshll.u32 %s1268_s12, 4  ;;  %s236_s9 = int_to_ptr.vmem [resolvable:$true] %s235_s9  ;;  %s260_s14 = int_to_ptr.vmem [resolvable:$true] %s259_s14 }
  0x54   : > { %s1068_s17 = scalar_lea.hbm %s1654_s2, 16 }
  0x55   : > { %p1069_p13 = scmp.ne.s32.totalorder %s1654_s2, %s1068_s17  ;;  %p1075_p4 = scmp.lt.u32.totalorder %s1068_s17, %s1654_s2 }
  0x57   : > { %p1071_p0 = pnand %p1069_p13, %p1367_p7 }
  0x59   : > { %p1072_p2 = pneg %p1071_p0 }
  0x5b   : > { %p1077_p6 = pnand %p1075_p4, %p1072_p2 }
  0x5d   : > { %1080 = shalt.err (!%p1077_p6)
}
  0x5e   : > { %s1081_s13 = scalar_lea.vmem %s236_s9, 16  ;;  %s1088_s23 = scalar_lea.vmem %s236_s9, 32 }
  0x5f   : > { %p1082_p8 = scmp.ne.s32.totalorder %s236_s9, %s1081_s13  ;;  %p1089_p11 = scmp.lt.s32.totalorder %s236_s9, %s236_s9 }
  0x60   : > { %p1090_p12 = scmp.lt.s32.totalorder %s1088_s23, %s1081_s13 }
  0x61   : > { %p1084_p9 = pnand %p1082_p8, %p1367_p7 }
  0x62   : > { %p1091_p1 = por %p1090_p12, %p1089_p11 }
  0x63   : > { %p1085_p10 = pneg %p1084_p9 }
  0x65   : > { %p1092_p3 = pnand %p1091_p1, %p1085_p10 }
  0x67   : > { %1095 = shalt.err (!%p1092_p3)
}
  0x68   : > { %904 = dma.hbm_to_vmem [thread:$0]  (!%p1351_p5), %s1654_s2, 16, %s236_s9, [#allocation6]  }
  0x69   : > { %s1096_s15 = scalar_lea.hbm %s1656_s4, 16 }
  0x6a   : > { %p1097_p13 = scmp.ne.s32.totalorder %s1656_s4, %s1096_s15  ;;  %p1103_p3 = scmp.lt.u32.totalorder %s1096_s15, %s1656_s4 }
  0x6c   : > { %p1099_p0 = pnand %p1097_p13, %p1367_p7 }
  0x6e   : > { %p1100_p1 = pneg %p1099_p0 }
  0x70   : > { %p1105_p2 = pnand %p1103_p3, %p1100_p1 }
  0x72   : > { %1108 = shalt.err (!%p1105_p2)
}
  0x73   : > { %s1109_s10 = scalar_lea.vmem %s260_s14, 16  ;;  %s1116_s9 = scalar_lea.vmem %s260_s14, 32 }
  0x74   : > { %p1110_p4 = scmp.ne.s32.totalorder %s260_s14, %s1109_s10  ;;  %p1117_p9 = scmp.lt.s32.totalorder %s260_s14, %s260_s14 }
  0x75   : > { %p1118_p10 = scmp.lt.s32.totalorder %s1116_s9, %s1109_s10 }
  0x76   : > { %p1112_p6 = pnand %p1110_p4, %p1367_p7 }
  0x77   : > { %p1119_p11 = por %p1118_p10, %p1117_p9 }
  0x78   : > { %p1113_p8 = pneg %p1112_p6 }
  0x7a   : > { %p1120_p12 = pnand %p1119_p11, %p1113_p8 }
  0x7c   : > { %1123 = shalt.err (!%p1120_p12)
}
  0x7d   : > { %910 = dma.hbm_to_vmem [thread:$0]  (!%p1351_p5), %s1656_s4, 16, %s260_s14, [#allocation9]  }
  0x7e   : > { %s1269_s23 = smov [#allocation13]   ;;  %s1124_s12 = scalar_lea.hbm %s1658_s6, 16 }
  0x7f   : > { %s283_s28 = sshll.u32 %s1269_s23, 4  ;;  %p1125_p13 = scmp.ne.s32.totalorder %s1658_s6, %s1124_s12  ;;  %s284_s28 = int_to_ptr.vmem [resolvable:$true] %s283_s28 }
  0x80   : > { %p1131_p3 = scmp.lt.u32.totalorder %s1124_s12, %s1658_s6 }
  0x81   : > { %p1127_p0 = pnand %p1125_p13, %p1367_p7 }
  0x83   : > { %p1128_p1 = pneg %p1127_p0 }
  0x85   : > { %p1133_p2 = pnand %p1131_p3, %p1128_p1 }
  0x87   : > { %1136 = shalt.err (!%p1133_p2)
}
  0x88   : > { %s1137_s14 = scalar_lea.vmem %s284_s28, 16  ;;  %s1144_s20 = scalar_lea.vmem %s284_s28, 32 }
  0x89   : > { %p1138_p4 = scmp.ne.s32.totalorder %s284_s28, %s1137_s14  ;;  %p1145_p9 = scmp.lt.s32.totalorder %s284_s28, %s284_s28 }
  0x8a   : > { %p1146_p10 = scmp.lt.s32.totalorder %s1144_s20, %s1137_s14 }
  0x8b   : > { %p1140_p6 = pnand %p1138_p4, %p1367_p7 }
  0x8c   : > { %p1147_p11 = por %p1146_p10, %p1145_p9 }
  0x8d   : > { %p1141_p8 = pneg %p1140_p6 }
  0x8f   : > { %p1148_p12 = pnand %p1147_p11, %p1141_p8 }
  0x91   : > { %1151 = shalt.err (!%p1148_p12)
}
  0x92   : > { %916 = dma.hbm_to_vmem [thread:$0]  (!%p1351_p5), %s1658_s6, 16, %s284_s28, [#allocation12]  }
  0x93   : > { %s774_s19 = sadd.s32 4294967294, %s1260_s27   ;;  %s1499_s11 = sadd.s32 1, %s1260_s27  }
  0x94   : > { %s30_s21 = ssub.s32 %s1260_s27, %s1499_s11  ;;  %s33_s13 = sadd.s32 1, %s1256_s26 }
  0x95   : > { %p31_p7 = scmp.eq.s32.totalorder %s30_s21, 0  ;;  %p40_p13 = scmp.ne.s32.totalorder %s1256_s26, %s1252_s25 }
  0x96   : > { %p41_p0 = scmp.eq.s32.totalorder %s1260_s27, 0  ;;  %p46_p1 = scmp.ne.s32.totalorder %s1252_s25, %s1248_s24 }
  0x97   : > { %s1510_s23 = scalar_select %p31_p7, %s1256_s26, %s33_s13  }
  0x98   : > { %p1512_p3 = por %p41_p0, %p40_p13  ;;  %p1667_p2 = scmp.eq.s32.totalorder %s1336_s30, 0 }
  0x99   : > { %p196_p4 = scmp.eq.s32.totalorder %s1336_s30, 2  ;;  %p202_p6 = scmp.eq.s32.totalorder %s774_s19, 2 }
  0x9a   : > { %p1518_p5 = por %p1667_p2, %p46_p1  ;;  %p931_p8 = scmp.lt.s32.totalorder %s1260_s27, 3 }
  0x9b   : > { %s294_s22 = sand.u32 1, %s1256_s26   ;;  %p1525_p9 = por %p196_p4, %p40_p13 }
  0x9c   : > { %p1529_p10 = por %p202_p6, %p46_p1  ;;  %s783_s16 = sshll.u32 %s294_s22, 3 }
  0x9d   : > { %s1669_s12 = scalar_select %p1525_p9, 1, 0 }
  0x9e   : > { %s1670_s15 = scalar_select %p1529_p10, 1, 0 }
  0x9f   : > { %s784_s17 = sshll.u32 %s1260_s27, 7  ;;  %s298_s10 = scalar_lea.vmem [#allocation2], %s783_s16 }
  0xa0   : > { %s1537_s20 = scalar_lea.hbm %s1652_s0, %s784_s17  ;;  %s305_s9 = sshll.u32 %s298_s10, 4  ;;  %s1539_s9 = int_to_ptr.vmem [resolvable:$true] %s305_s9 }
  0xa1   : > { %p1543_p11 = pnand %p931_p8, %p1512_p3  ;;  %s295_s21 = scalar_lea.sflag [#allocation3], %s294_s22 }
  0xa2   : > { %s1152_s13 = scalar_lea.hbm %s1537_s20, 128  ;;  %s1157_s18 = scalar_lea.hbm %s1652_s0, 384 }
  0xa3   : > { %p1153_p12 = scmp.ne.s32.totalorder %s1537_s20, %s1152_s13  ;;  %p1154_p7 = pneg %p1543_p11 }
  0xa4   : > { %p1158_p1 = scmp.lt.u32.totalorder %s1537_s20, %s1652_s0  ;;  %p1159_p3 = scmp.lt.u32.totalorder %s1157_s18, %s1152_s13 }
  0xa5   : > { %p1155_p13 = pnand %p1154_p7, %p1153_p12  ;;  %p1161_p4 = scmp.lt.u32.totalorder %s1152_s13, %s1537_s20 }
  0xa6   : > { %p1160_p2 = por %p1159_p3, %p1158_p1 }
  0xa7   : > { %p1156_p0 = pneg %p1155_p13 }
  0xa8   : > { %p1162_p6 = por %p1161_p4, %p1160_p2 }
  0xaa   : > { %p1163_p8 = pnand %p1162_p6, %p1156_p0 }
  0xac   : > { %1166 = shalt.err (!%p1163_p8)
}
  0xad   : > { %s1167_s22 = scalar_lea.vmem %s1539_s9, 128  ;;  %s1270_s10 = smov [#allocation2]  }
  0xae   : > { %p1168_p12 = scmp.ne.s32.totalorder %s1539_s9, %s1167_s22  ;;  %s1172_s16 = sshll.u32 %s1270_s10, 4  ;;  %s1173_s16 = int_to_ptr.vmem [resolvable:$false] %s1172_s16 }
  0xaf   : > { %s1174_s17 = scalar_lea.vmem %s1173_s16, 256  ;;  %p1175_p9 = scmp.lt.s32.totalorder %s1539_s9, %s1173_s16 }
  0xb0   : > { %p1170_p13 = pnand %p1168_p12, %p1154_p7  ;;  %p1176_p1 = scmp.lt.s32.totalorder %s1174_s17, %s1167_s22 }
  0xb2   : > { %p1171_p10 = pneg %p1170_p13  ;;  %p1177_p3 = por %p1176_p1, %p1175_p9 }
  0xb4   : > { %p1178_p2 = pnand %p1177_p3, %p1171_p10 }
  0xb6   : > { %1181 = shalt.err (!%p1178_p2)
}
  0xb7   : > { %920 = dma.hbm_to_vmem [thread:$0]  (!%p1543_p11), %s1537_s20, 128, %s1539_s9, %s295_s21  }
  0xb8   : > { %p1672_p0 = scmp.ne.s32.totalorder %s1663_s8, 0 }
  0xb9   : > { %s1575_s13 = sand.u32 (!%p1672_p0), 1, %s1252_s25  }
  0xba   : > { %314 = sbr.rel (%p1672_p0) target bundleno = 885 (0x375), region = 48  ;;  %s786_s18 = sshll.u32 (!%p1672_p0), %s1575_s13, 3 }
  0xbb   : > { %s317_s29 = scalar_lea.sflag (!%p1672_p0), [#allocation3], %s1575_s13  ;;  %s320_s14 = scalar_lea.vmem (!%p1672_p0), [#allocation2], %s786_s18 }
  0xc1   : > { %1227 = dma.done.wait (%p1518_p5), %s317_s29, 128  }
  0xc2   : > { %1229 = vsyncadd (%p1518_p5), %s317_s29, 4294967168  ;;  %p1673_p9 = scmp.eq.s32.totalorder %s1336_s30, 0 }
  0xc4   : > { %1231 = dma.done.wait (%p1673_p9), [#allocation6], 528   ;;  %p1674_p10 = pmov %p1673_p9 }
  0xc5   : > { %p1675_p11 = pmov %p1673_p9 }
  0xc6   : > { %1233 = vsyncadd (%p1674_p10), [#allocation6], 4294966768 }
  0xc7   : > { %1235 = dma.done.wait (%p1675_p11), [#allocation9], 528   ;;  %p1676_p7 = pmov %p1673_p9 }
  0xc9   : > { %1237 = vsyncadd (%p1676_p7), [#allocation9], 4294966768  ;;  %p1677_p4 = pmov %p1676_p7 }
  0xcb   : > { %1239 = dma.done.wait (%p1677_p4), [#allocation12], 528   ;;  %p1678_p6 = pmov %p1677_p4 }
  0xcc   : > { %v1271_v0 = vmov 0.0|0.0   ;;  %vm1272_vm0 = vmmov 0   ;;  %v1273_v1 = vmov 0.0   ;;  %v376_v2 = vld [vmem:[#allocation5] sm:$0xff]  ;;  %v377_v3 = vld [vmem:[#allocation5 + $0x8] sm:$0xff]  ;;  %v378_v4 = vld [vmem:[#allocation5 + $0x10] sm:$0xff] }
  0xcd   : > { %1241 = vsyncadd (%p1678_p6), [#allocation12], 4294966768  ;;  %852 = vmatprep.subr.bf16.mxu0 %v1271_v0  ;;  %827 = vmatprep.mubr.msk.f32.mxu0 %vm1272_vm0, %v1273_v1  ;;  %v853_v5 = vpack.c.bf16 %v377_v3, %v376_v2  ;;  %v379_v6 = vld [vmem:[#allocation5 + $0x18] sm:$0xff]  ;;  %v462_v7 = vld [vmem:[#allocation8] sm:$0xff]  ;;  %vm387_vm1 = vcmask 261120   ;;  %s801_s8 = sshll.u32 %s1336_s30, 7 }
  0xce   : > { %858 = vmatprep.subr.bf16.mxu1 %v1271_v0  ;;  %838 = vmatprep.mubr.msk.f32.mxu1 %vm1272_vm0, %v1273_v1  ;;  %v463_v8 = vld [vmem:[#allocation8 + $0x8] sm:$0xff]  ;;  %v856_v9 = vpack.c.bf16 %v379_v6, %v378_v4  ;;  %v464_v12 = vld [vmem:[#allocation8 + $0x10] sm:$0xff]  ;;  %v465_v13 = vld [vmem:[#allocation8 + $0x18] sm:$0xff]  ;;  %s374_s28 = scalar_lea.vmem [#allocation14], %s786_s18  ;;  %s1609_s21 = scalar_lea.hbm %s1659_s7, %s801_s8 }
  0xcf   : > { %854 = vmatpush3.bf16.msra.mxu0 %v853_v5  ;;  %v859_v10 = vpack.c.bf16 %v463_v8, %v462_v7  ;;  %v375_v11 = vld [vmem:[%s320_s14] sm:$0xff]  ;;  %v862_v14 = vpack.c.bf16 %v465_v13, %v464_v12  ;;  %v547_v15 = vld [vmem:[#allocation11] sm:$0xff]  ;;  %v794_v18 = vld [vmem:[#allocation7] ss:$0 sm:$0xff]  ;;  %s647_s20 = sshll.u32 %s374_s28, 4  ;;  %s634_s22 = scalar_lea.sflag [#allocation4], %s1575_s13  ;;  %s1611_s20 = int_to_ptr.vmem [resolvable:$true] %s647_s20 }
  0xd0   : > { %855 = vmatprep.subr.bf16.mxu0 %v1271_v0  ;;  %v548_v16 = vld [vmem:[#allocation11 + $0x8] sm:$0xff]  ;;  %v549_v23 = vld [vmem:[#allocation11 + $0x10] sm:$0xff]  ;;  %v550_v24 = vld [vmem:[#allocation11 + $0x18] sm:$0xff]  ;;  %s1182_s10 = scalar_lea.vmem %s1611_s20, 128  ;;  %p1679_p8 = scmp.ne.s32.totalorder %s1669_s12, 0 }
  0xd1   : > { %860 = vmatpush3.bf16.msra.mxu1 %v859_v10  ;;  %v865_v17 = vpack.c.bf16 %v548_v16, %v547_v15  ;;  %v868_v25 = vpack.c.bf16 %v550_v24, %v549_v23  ;;  %v796_v26 = vld [vmem:[#allocation10] ss:$0 sm:$0xff]  ;;  %v798_v31 = vld [vmem:[#allocation13] ss:$0 sm:$0xff]  ;;  %p1183_p5 = scmp.ne.s32.totalorder %s1611_s20, %s1182_s10  ;;  %s1274_s30 = smov [#allocation14]  }
  0xd2   : > { %861 = vmatprep.subr.bf16.mxu1 %v1271_v0  ;;  %s1186_s16 = sshll.u32 %s1274_s30, 4  ;;  %s1187_s16 = int_to_ptr.vmem [resolvable:$false] %s1186_s16 }
  0xd3   : > { %857 = vmatpush3.bf16.msra.mxu0 %v856_v9  ;;  %p1184_p12 = pnand %p1183_p5, %p1679_p8  ;;  %s1188_s17 = scalar_lea.vmem %s1187_s16, 256 }
  0xd4   : > { %864 = vmatprep.subr.bf16.mxu0 %v1271_v0  ;;  %p1189_p1 = scmp.lt.s32.totalorder %s1611_s20, %s1187_s16  ;;  %p1190_p3 = scmp.lt.s32.totalorder %s1188_s17, %s1182_s10 }
  0xd5   : > { %863 = vmatpush3.bf16.msra.mxu1 %v862_v14  ;;  %p1185_p13 = pneg %p1184_p12 }
  0xd6   : > { %828 = vmatmul.mubr.msk.f32.vlgmr.msra.gmra.mrb[0].mxu0 %vm387_vm1, %v375_v11  ;;  %p1191_p2 = por %p1190_p3, %p1189_p1 }
  0xd7   : > { %849 = vmatprep.mubr.msk.f32.mxu0 %vm1272_vm0, %v1273_v1  ;;  %866 = vmatpush3.bf16.msra.mxu0 %v865_v17 }
  0xd8   : > { %867 = vmatprep.subr.bf16.mxu0 %v1271_v0  ;;  %p1192_p0 = pnand %p1191_p2, %p1185_p13 }
  0xdb   : > { %869 = vmatpush3.bf16.msra.mxu0 %v868_v25 }
 0x1a9   : > { %v457_v19 = vpop.f32.mrb[0].mxu0 }
 0x1aa   : > { %v458_v20 = vadd.f32 %v794_v18, %v457_v19  ;;  %v829_v21 = vpop.f32.mrb[1].mxu0 }
 0x1ac   : > { %v461_v22 = vmax.f32 %v458_v20, 0.0 }
 0x1ae   : > { %839 = vmatmul.mubr.msk.f32.vlgmr.msra.gmra.mrb[0].mxu1 %vm387_vm1, %v461_v22 }
 0x281   : > { %v542_v27 = vpop.f32.mrb[0].mxu1 }
 0x282   : > { %v543_v28 = vadd.f32 %v796_v26, %v542_v27  ;;  %v840_v29 = vpop.f32.mrb[1].mxu1 }
 0x284   : > { %v546_v30 = vmax.f32 %v543_v28, 0.0 }
 0x286   : > { %850 = vmatmul.mubr.msk.f32.vlgmr.msra.gmra.mrb[2].mxu0 %vm387_vm1, %v546_v30 }
 0x359   : > { %v627_v32 = vpop.f32.mrb[2].mxu0 }
 0x35a   : > { %v628_v33 = vadd.f32 %v798_v31, %v627_v32  ;;  %v851_v34 = vpop.f32.mrb[3].mxu0 }
 0x35c   : > { %982 = vtanh.f32 %v628_v33 }
 0x366   : > { %v983_v35 = vpop.eup %982 }
 0x367   : > { %632 = vst [vmem:[%s374_s28] sm:$0xff] %v983_v35 }
 0x368   : > { %1195 = shalt.err (!%p1192_p0)
}
 0x369   : > { %s1196_s13 = scalar_lea.hbm %s1609_s21, 128  ;;  %s1200_s14 = scalar_lea.hbm %s1659_s7, 384 }
 0x36a   : > { %p1197_p9 = scmp.ne.s32.totalorder %s1609_s21, %s1196_s13  ;;  %p1201_p7 = scmp.lt.u32.totalorder %s1609_s21, %s1659_s7 }
 0x36b   : > { %p1202_p4 = scmp.lt.u32.totalorder %s1200_s14, %s1196_s13  ;;  %p1204_p5 = scmp.lt.u32.totalorder %s1196_s13, %s1609_s21 }
 0x36c   : > { %p1198_p10 = pnand %p1197_p9, %p1679_p8 }
 0x36d   : > { %p1203_p6 = por %p1202_p4, %p1201_p7 }
 0x36e   : > { %p1199_p11 = pneg %p1198_p10 }
 0x36f   : > { %p1205_p12 = por %p1204_p5, %p1203_p6 }
 0x371   : > { %p1206_p13 = pnand %p1205_p12, %p1199_p11 }
 0x373   : > { %1209 = shalt.err (!%p1206_p13)
}
 0x374   : > { %896 = dma.vmem_to_hbm [thread:$0]  (%p1679_p8), %s1611_s20, 128, %s1609_s21, %s634_s22  }
 0x375 PF: > { %p938_p1 = scmp.ge.s32.totalorder %s1260_s27, 2  ;;  %s659_s9 = sand.u32 1, %s1248_s24  }
 0x376   : > { %p1680_p3 = scmp.ne.s32.totalorder %s1670_s15, 0  ;;  %s660_s19 = scalar_lea.sflag [#allocation4], %s659_s9 }
 0x378   : > { %p922_p2 = pnand %p938_p1, %p1680_p3 }
 0x37a   : > { %1243 = dma.done.wait (!%p922_p2), %s660_s19, 128  }
 0x37b   : > { %1245 = vsyncadd (!%p922_p2), %s660_s19, 4294967168  ;;  %p23_p0 = scmp.ge.s32.totalorder %s1499_s11, 5   ;;  %s1681_s24 = smov %s1252_s25 }
 0x37c   : > { %s1682_s25 = smov %s1256_s26  ;;  %s1683_s26 = smov %s1510_s23 }
 0x37d   : > { %s1684_s27 = smov %s1499_s11  ;;  %25 = sbr.rel (!%p23_p0) target bundleno = 8 (0x8), region = 117 }
 0x384   :  { %665 = vsyncpa [#allocation3], 1 }
 0x385   :  { %667 = vsyncpa [#allocation3 + $0x1], 1 }
 0x386   :  { %668 = vsyncpa [#allocation6], 1 }
 0x387   :  { %669 = vsyncpa [#allocation9], 1 }
 0x388   :  { %670 = vsyncpa [#allocation12], 1 }
 0x389   :  { %671 = vsyncpa [#allocation4], 1 }
 0x38a   :  { %673 = vsyncpa [#allocation4 + $0x1], 1 }

</bundles_post_ra>
